<compile_context>
chip_gen: v7x
topology: tpu7x:2x2x1
jax: 0.10.0
libtpu: 0.0.40
codegen_flags: <defaults>
</compile_context>

<pallas_src>
import functools
import math

import jax
import jax.numpy as jnp
from jax import lax
from jax.experimental import pallas as pl
from jax.experimental.pallas import tpu as pltpu

EPS = 1e-6


# ----------------------------------------------------------------------------
# Per-generation budgets (trace-time)
# ----------------------------------------------------------------------------
@functools.lru_cache(maxsize=None)
def _vmem_budgets():
    """(per-block byte budget, scoped vmem_limit_bytes) per TPU generation."""
    try:
        cap = pltpu.get_tpu_info().vmem_capacity_bytes
    except Exception:                     # conservative fallback if query fails
        cap = 64 * 1024 * 1024
    if cap >= 96 * 1024 * 1024:           # v5e / v6e class parts: 128 MiB VMEM
        return 8 * 1024 * 1024, 96 * 1024 * 1024
    return 4 * 1024 * 1024, 48 * 1024 * 1024   # v7x class: 64 MiB physical VMEM


# ----------------------------------------------------------------------------
# Tile / grouping pickers (trace-time Python)
# ----------------------------------------------------------------------------
def _pick_row_tile(rows, lane_width, itemsize, batch):
    """Spatial (sublane) tile: dtype-aware budget, multiple of 8, exact-divisor
    preference (no masked tail), and >=2 total grid points so both v7x
    TensorCores get work. Never returns an over-budget full-extent block."""
    block_budget, _ = _vmem_budgets()
    if rows <= 8:
        return rows
    budget_rows = max(8, block_budget // max(1, itemsize * lane_width))
    if budget_rows >= rows:
        tile = rows                            # whole extent fits the budget
    else:
        tile = max(8, (budget_rows // 8) * 8)  # budget-sized, 8-aligned
        cand = tile
        while cand >= 8:                       # prefer an exact divisor of rows
            if rows % cand == 0:
                tile = cand
                break
            cand -= 8
        # if no divisor found we keep the budget-sized tile; the pl.cdiv grid
        # masks the (read-garbage, write-dropped) tail rows.
    if batch * pl.cdiv(rows, tile) < 2:
        half = max(8, ((pl.cdiv(rows, 2) + 7) // 8) * 8)
        tile = min(tile, half)                 # split for dual-TC parts (v7x)
    return tile


def _pick_group(hw, c):
    """Fold G spatial rows into the lane axis so the last dim (G*C) is a
    multiple of 128 (lane-dense loads/stores). Returns 1 when C is already
    lane-aligned or no compatible grouping exists."""
    if c <= 0 or c % 128 == 0:
        return 1
    g0 = 128 // math.gcd(c, 128)
    for mult in range(1, 9):
        g = g0 * mult
        if g <= hw and hw % g == 0:
            return g
    return 1   # fall back to a non-lane-dense (masked-store) layout


# ----------------------------------------------------------------------------
# Kernel helpers
# ----------------------------------------------------------------------------
def _exact_dot(a, b):
    """f32-accurate MXU matmul independent of the backend's default f32 matmul
    precision: split `a` into a bf16-exact high part plus residual. `b` only
    holds 0/1 entries (bf16-exact); accumulation is f32."""
    a_hi = a.astype(jnp.bfloat16).astype(jnp.float32)
    a_lo = a - a_hi
    return (jnp.dot(a_hi, b, preferred_element_type=jnp.float32)
            + jnp.dot(a_lo, b, preferred_element_type=jnp.float32))


# ----------------------------------------------------------------------------
# Kernel 1: conditioning path  mod = SiLU(emb) @ W + b   (single step)
# ----------------------------------------------------------------------------
def _mod_kernel(emb_ref, w_ref, b_ref, o_ref):
    e = emb_ref[...].astype(jnp.float32)
    silu = e * jax.nn.sigmoid(e)                 # sigmoid -> EUP slot
    # Weights kept in their stored dtype (bf16 weights would get full MXU rate;
    # kept f32 here so results match the f32 reference to <=1e-4).
    o_ref[...] = (jnp.dot(silu.astype(w_ref.dtype), w_ref[...],
                          preferred_element_type=jnp.float32)
                  + b_ref[...].astype(jnp.float32))


def modulation(emb, w, b):
    """W is tiny (E x mult*C) and B rows underfill the MXU, so one un-gridded
    step (whole arrays in VMEM) beats any output tiling."""
    bsz = emb.shape[0]
    out_dim = w.shape[1]
    _, vmem_limit = _vmem_budgets()
    return pl.pallas_call(
        _mod_kernel,
        out_shape=jax.ShapeDtypeStruct((bsz, out_dim), jnp.float32),
        compiler_params=pltpu.CompilerParams(vmem_limit_bytes=vmem_limit),
    )(emb, w, b.reshape(1, out_dim))


# ----------------------------------------------------------------------------
# Kernel 2a: lane-aligned LN + affine   y = LN(x) * a + b
#            x block: (T, C) with C a multiple of 128 (or unalignable fallback)
# ----------------------------------------------------------------------------
def _ln_dense_kernel(x_ref, a_ref, b_ref, o_ref):
    x = x_ref[...].astype(jnp.float32)                    # (T, C)
    inv_c = 1.0 / x.shape[-1]
    mean = jnp.sum(x, axis=-1, keepdims=True) * inv_c
    d = x - mean                                          # two-pass variance
    var = jnp.sum(d * d, axis=-1, keepdims=True) * inv_c
    xn = d * lax.rsqrt(var + EPS)
    o_ref[...] = (xn * a_ref[...].astype(jnp.float32)
                  + b_ref[...].astype(jnp.float32)).astype(o_ref.dtype)


# ----------------------------------------------------------------------------
# Kernel 2b: lane-dense LN + affine for C not a multiple of 128.
#            G spatial rows are folded into the lane axis (K = G*C, K%128==0);
#            per-segment moments run on the otherwise-idle MXU.
# ----------------------------------------------------------------------------
def _ln_grouped_kernel(x_ref, a_ref, b_ref, o_ref, *, c):
    x = x_ref[...].astype(jnp.float32)                    # (T, K) , K = G*c
    k = x.shape[-1]
    g = k // c
    gp = max(8, ((g + 7) // 8) * 8)                       # pad reduce width
    # gather (K, gp): column j sums the lanes of segment j
    seg = (lax.broadcasted_iota(jnp.int32, (k, gp), 0) // c
           == lax.broadcasted_iota(jnp.int32, (k, gp), 1)).astype(jnp.float32)
    # scatter (gp, K): row j broadcasts a per-segment scalar back to its lanes
    seg_t = (lax.broadcasted_iota(jnp.int32, (gp, k), 0)
             == lax.broadcasted_iota(jnp.int32, (gp, k), 1) // c
             ).astype(jnp.float32)
    inv_c = 1.0 / c
    mean_g = _exact_dot(x, seg) * inv_c                   # (T, gp)
    mean = _exact_dot(mean_g, seg_t)                      # (T, K)
    d = x - mean                                          # two-pass variance
    var_g = _exact_dot(d * d, seg) * inv_c                # (T, gp)
    inv_std = _exact_dot(lax.rsqrt(var_g + EPS), seg_t)   # (T, K)
    o_ref[...] = (d * inv_std * a_ref[...].astype(jnp.float32)
                  + b_ref[...].astype(jnp.float32)).astype(o_ref.dtype)


def _ln_affine(x3, a3, b3, c):
    """x3: (B, R, K) with K = G*c; per-segment LayerNorm (segments of c lanes)
    followed by y = xn * a + b, a/b per-batch of shape (B, 1, K)."""
    bsz, rows, k = x3.shape
    tile = _pick_row_tile(rows, k, x3.dtype.itemsize, bsz)
    grid = (bsz, pl.cdiv(rows, tile))
    _, vmem_limit = _vmem_budgets()
    kernel = (_ln_dense_kernel if k == c
              else functools.partial(_ln_grouped_kernel, c=c))
    return pl.pallas_call(
        kernel,
        out_shape=jax.ShapeDtypeStruct((bsz, rows, k), x3.dtype),
        grid_spec=pl.GridSpec(
            grid=grid,
            in_specs=[pl.BlockSpec((None, tile, k), lambda b, t: (b, t, 0)),
                      pl.BlockSpec((None, 1, k), lambda b, t: (b, 0, 0)),
                      pl.BlockSpec((None, 1, k), lambda b, t: (b, 0, 0))],
            out_specs=pl.BlockSpec((None, tile, k), lambda b, t: (b, t, 0))),
        compiler_params=pltpu.CompilerParams(
            dimension_semantics=("parallel", "parallel"),
            vmem_limit_bytes=vmem_limit),
    )(x3, a3, b3)


# ----------------------------------------------------------------------------
# Parameter construction (mirrors nn.Module.__init__ shapes)
# ----------------------------------------------------------------------------
def make_params(key, in_channels, embedding_dim=None, num_embeddings=None,
                adaLN_Zero=False, bias=True):
    params = {"in_channels": in_channels, "adaLN_Zero": adaLN_Zero,
              "embedding_dim": embedding_dim}
    if embedding_dim is None:
        params["ln_weight"] = jnp.ones((in_channels,), jnp.float32)
        params["ln_bias"] = jnp.zeros((in_channels,), jnp.float32)
    else:
        mult = 3 if adaLN_Zero else 2
        params["multiplier"] = mult
        k1, k2, k3 = jax.random.split(key, 3)
        if num_embeddings is not None:
            params["emb_table"] = jax.random.normal(                # nn.Embedding: N(0,1)
                k1, (num_embeddings, embedding_dim), jnp.float32)
        bound = 1.0 / (embedding_dim ** 0.5)                        # nn.Linear default
        params["lin_w"] = jax.random.uniform(
            k2, (embedding_dim, mult * in_channels), jnp.float32, -bound, bound)
        if bias:
            params["lin_b"] = jax.random.uniform(
                k3, (mult * in_channels,), jnp.float32, -bound, bound)
        else:
            params["lin_b"] = jnp.zeros((mult * in_channels,), jnp.float32)
    return params


# ----------------------------------------------------------------------------
# Forward (glue in plain JAX, hot paths in Pallas)
# ----------------------------------------------------------------------------
def ada_layer_norm(params, x, emb=None, class_labels=None):
    B, H, W, C = x.shape
    HW = H * W

    if params["embedding_dim"] is not None and "emb_table" in params:
        # Trivial (B,)-row gather; left to XLA glue.
        emb = jnp.take(params["emb_table"], class_labels, axis=0)

    if emb is not None and params["embedding_dim"] is not None:
        mod = modulation(emb, params["lin_w"], params["lin_b"])     # (B, mult*C) f32
        if params["multiplier"] == 2:
            shift, scale = mod[:, :C], mod[:, C:2 * C]
            gate = 1.0
        else:
            shift, scale, gate_flat = mod[:, :C], mod[:, C:2 * C], mod[:, 2 * C:]
            # NOTE: (B, C, 1, 1) mirrors the PyTorch module exactly; downstream
            # NHWC code must transpose/reshape before broadcasting against out.
            gate = gate_flat[:, :, None, None]
        a = 1.0 + scale                                              # (B, C)
        b = shift
    else:
        a = jnp.broadcast_to(params["ln_weight"][None, :].astype(jnp.float32), (B, C))
        b = jnp.broadcast_to(params["ln_bias"][None, :].astype(jnp.float32), (B, C))
        gate = 1.0

    g = _pick_group(HW, C)
    K = g * C
    rows = HW // g
    x3 = x.reshape(B, rows, K)        # free: row-major contiguity is preserved
    if g > 1:
        a3 = jnp.tile(a, (1, g)).reshape(B, 1, K)
        b3 = jnp.tile(b, (1, g)).reshape(B, 1, K)
    else:
        a3 = a.reshape(B, 1, C)
        b3 = b.reshape(B, 1, C)
    out = _ln_affine(x3, a3, b3, C)
    return out.reshape(B, H, W, C), gate


# ----------------------------------------------------------------------------
# Pure-JAX reference
# ----------------------------------------------------------------------------
def _ref_forward(params, x, emb=None, class_labels=None):
    C = x.shape[-1]
    if params["embedding_dim"] is not None and "emb_table" in params:
        emb = jnp.take(params["emb_table"], class_labels, axis=0)
    mean = jnp.mean(x, axis=-1, keepdims=True)
    var = jnp.mean((x - mean) ** 2, axis=-1, keepdims=True)
    xn = (x - mean) / jnp.sqrt(var + EPS)
    if emb is not None and params["embedding_dim"] is not None:
        e = emb * jax.nn.sigmoid(emb)
        mod = e @ params["lin_w"] + params["lin_b"]
        if params["multiplier"] == 2:
            shift, scale = mod[:, :C], mod[:, C:2 * C]
            gate = 1.0
        else:
            shift, scale, gg = mod[:, :C], mod[:, C:2 * C], mod[:, 2 * C:]
            gate = gg[:, :, None, None]
        y = xn * (1 + scale[:, None, None, :]) + shift[:, None, None, :]
        return y, gate
    return xn * params["ln_weight"] + params["ln_bias"], 1.0


if __name__ == "__main__":
    key = jax.random.PRNGKey(0)
    kx, kp1, kp2, kp3, kp4, ke, kx2, ke2 = jax.random.split(key, 8)

    B, H, W, C = 2, 8, 8, 32          # C=32 exercises the lane-dense grouped path
    E, NE = 16, 10

    x = jax.random.normal(kx, (B, H, W, C), jnp.float32)
    class_labels = jnp.array([1, 7], dtype=jnp.int32)

    # --- adaLN-Zero path with learned embedding table (grouped kernel) ---
    params_zero = make_params(kp1, C, embedding_dim=E, num_embeddings=NE,
                              adaLN_Zero=True, bias=True)
    y, gate = ada_layer_norm(params_zero, x, class_labels=class_labels)
    jax.block_until_ready(y); jax.block_until_ready(gate)
    y_ref, gate_ref = _ref_forward(params_zero, x, class_labels=class_labels)
    assert y.shape == (B, H, W, C) and gate.shape == (B, C, 1, 1)
    assert jnp.allclose(y, y_ref, atol=1e-4, rtol=1e-4)
    assert jnp.allclose(gate, gate_ref, atol=1e-5, rtol=1e-5)

    # --- adaLN path (multiplier=2) with emb passed directly ---
    params_ada = make_params(kp3, C, embedding_dim=E, num_embeddings=None,
                             adaLN_Zero=False, bias=True)
    emb_in = jax.random.normal(ke, (B, E), jnp.float32)
    y1, gate1 = ada_layer_norm(params_ada, x, emb=emb_in)
    jax.block_until_ready(y1)
    y1_ref, _ = _ref_forward(params_ada, x, emb=emb_in)
    assert y1.shape == (B, H, W, C) and gate1 == 1.0
    assert jnp.allclose(y1, y1_ref, atol=1e-4, rtol=1e-4)

    # --- plain (non-adaptive) LayerNorm path ---
    params_ln = make_params(kp2, C, embedding_dim=None)
    y2, gate2 = ada_layer_norm(params_ln, x)
    jax.block_until_ready(y2)
    y2_ref, _ = _ref_forward(params_ln, x)
    assert y2.shape == (B, H, W, C) and gate2 == 1.0
    assert jnp.allclose(y2, y2_ref, atol=1e-4, rtol=1e-4)

    # --- lane-aligned (C % 128 == 0), batch=1: dense kernel + forced 2-way grid ---
    B2, C2, E2 = 1, 128, 32
    x2 = jax.random.normal(kx2, (B2, 8, 8, C2), jnp.float32)
    emb2 = jax.random.normal(ke2, (B2, E2), jnp.float32)
    params_d = make_params(kp4, C2, embedding_dim=E2, num_embeddings=None,
                           adaLN_Zero=True, bias=True)
    y3, gate3 = ada_layer_norm(params_d, x2, emb=emb2)
    jax.block_until_ready(y3)
    y3_ref, gate3_ref = _ref_forward(params_d, x2, emb=emb2)
    assert y3.shape == (B2, 8, 8, C2) and gate3.shape == (B2, C2, 1, 1)
    assert jnp.allclose(y3, y3_ref, atol=1e-4, rtol=1e-4)
    assert jnp.allclose(gate3, gate3_ref, atol=1e-5, rtol=1e-5)

    print("KERNEL_OK")
</pallas_src>

<mosaic_0001>
module attributes {stable_mosaic.version = 11 : i64} {
  func.func @_mod_kernel(%arg0: memref<2x16xf32, #tpu.memory_space<vmem>>, %arg1: memref<16x96xf32, #tpu.memory_space<vmem>>, %arg2: memref<1x96xf32, #tpu.memory_space<vmem>>, %arg3: memref<2x96xf32, #tpu.memory_space<vmem>>) attributes {dimension_semantics = [], scalar_prefetch = 0 : i64, scratch_operands = 0 : i64, tpu.core_type = #tpu.core_type<tc>} {
    %c0 = arith.constant 0 : index
    %c0_0 = arith.constant 0 : index
    %0 = vector.load %arg0[%c0, %c0_0] : memref<2x16xf32, #tpu.memory_space<vmem>>, vector<2x16xf32>
    %1 = arith.negf %0 : vector<2x16xf32>
    %2 = math.exp %1 : vector<2x16xf32>
    %cst = arith.constant 1.000000e+00 : f32
    %3 = vector.broadcast %cst : f32 to vector<2x16xf32>
    %4 = arith.addf %3, %2 : vector<2x16xf32>
    %5 = arith.divf %3, %4 : vector<2x16xf32>
    %6 = arith.mulf %0, %5 : vector<2x16xf32>
    %c0_1 = arith.constant 0 : index
    %c0_2 = arith.constant 0 : index
    %7 = vector.load %arg1[%c0_1, %c0_2] : memref<16x96xf32, #tpu.memory_space<vmem>>, vector<16x96xf32>
    %cst_3 = arith.constant dense<0.000000e+00> : vector<2x96xf32>
    %8 = tpu.matmul %6, %7, %cst_3 {dimension_numbers = #tpu.dot_dimension_numbers<[1], [0], [0], [1], [0, 0, 1, 1], [], []>} : vector<2x16xf32>, vector<16x96xf32>, vector<2x96xf32> -> vector<2x96xf32>
    %c0_4 = arith.constant 0 : index
    %c0_5 = arith.constant 0 : index
    %9 = vector.load %arg2[%c0_4, %c0_5] : memref<1x96xf32, #tpu.memory_space<vmem>>, vector<1x96xf32>
    %10 = vector.broadcast %9 : vector<1x96xf32> to vector<2x96xf32>
    %11 = arith.addf %8, %10 : vector<2x96xf32>
    %c0_6 = arith.constant 0 : index
    %c0_7 = arith.constant 0 : index
    %12 = vector.load %arg3[%c0_6, %c0_7] : memref<2x96xf32, #tpu.memory_space<vmem>>, vector<2x96xf32>
    tpu.vector_store %arg3[%c0_6, %c0_7], %11 {strides = array<i32>} : memref<2x96xf32, #tpu.memory_space<vmem>>, vector<2x96xf32>,
    return
  }
}

</mosaic_0001>

<bundles_post_ra>
// kernel: tpu_custom_call.1
= control target key start
LH: loop header
LB: loop body
LE: loop exit
PB: predicated region body
PF: predicated region fallthrough
CT: control target
= control target key end

     0   :  { %8 = vsyncpa [#allocation3], 0  ;;  %s324_s0 = inlined_call_operand.hbm [shape: f32[2,16], index: 0, kind: input, shape index: {}]   ;;  %s325_s1 = inlined_call_operand.hbm [shape: f32[16,96], index: 1, kind: input, shape index: {}]   ;;  %s326_s2 = inlined_call_operand.vmem [shape: f32[1,96], index: 2, kind: input, shape index: {}]   ;;  %s327_s3 = inlined_call_operand.hbm [shape: f32[2,96], index: 3, kind: output, shape index: {}]  }
   0x1   :  { %9 = vsyncpa [#allocation6], 0 }
   0x2   :  { %10 = vsyncpa [#allocation4], 0  ;;  %s250_s12 = smov [#allocation2]   ;;  %s251_s14 = smov [#allocation5]  }
   0x3   :  { %s17_s13 = sshll.u32 %s250_s12, 4  ;;  %s26_s15 = sshll.u32 %s251_s14, 4  ;;  %s18_s13 = int_to_ptr.vmem [resolvable:$true] %s17_s13  ;;  %s278_s15 = int_to_ptr.vmem [resolvable:$true] %s26_s15 }
   0x4   :  { %s178_s18 = scalar_lea.hbm %s324_s0, 32 }
   0x5   :  { %p179_p0 = scmp.ne.s32.totalorder %s324_s0, %s178_s18  ;;  %p182_p1 = scmp.lt.u32.totalorder %s178_s18, %s324_s0 }
   0x7   :  { %p184_p2 = pnand %p182_p1, %p179_p0 }
   0x9   :  { %187 = shalt.err (!%p184_p2)
}
   0xa   :  { %s188_s23 = scalar_lea.vmem %s18_s13, 32  ;;  %p193_p4 = scmp.lt.s32.totalorder %s18_s13, %s18_s13 }
   0xb   :  { %p189_p3 = scmp.ne.s32.totalorder %s18_s13, %s188_s23  ;;  %p194_p5 = scmp.lt.s32.totalorder %s188_s23, %s188_s23 }
   0xd   :  { %p195_p6 = por %p194_p5, %p193_p4 }
   0xf   :  { %p196_p7 = pnand %p195_p6, %p189_p3 }
  0x11   :  { %199 = shalt.err (!%p196_p7)
}
  0x12   :  { %20 = dma.hbm_to_vmem [thread:$0]  %s324_s0, 32, %s18_s13, [#allocation3]  }
  0x13   :  { %s200_s28 = scalar_lea.hbm %s325_s1, 256 }
  0x14   :  { %p201_p8 = scmp.ne.s32.totalorder %s325_s1, %s200_s28  ;;  %p204_p9 = scmp.lt.u32.totalorder %s200_s28, %s325_s1 }
  0x16   :  { %p206_p10 = pnand %p204_p9, %p201_p8 }
  0x18   :  { %209 = shalt.err (!%p206_p10)
}
  0x19   :  { %s210_s6 = scalar_lea.vmem %s278_s15, 256  ;;  %p215_p12 = scmp.lt.s32.totalorder %s278_s15, %s278_s15 }
  0x1a   :  { %p211_p11 = scmp.ne.s32.totalorder %s278_s15, %s210_s6  ;;  %p216_p13 = scmp.lt.s32.totalorder %s210_s6, %s210_s6 }
  0x1c   :  { %p217_p0 = por %p216_p13, %p215_p12 }
  0x1e   :  { %p218_p1 = pnand %p217_p0, %p211_p11 }
  0x20   :  { %221 = shalt.err (!%p218_p1)
}
  0x21   :  { %s252_s0 = smov 128   ;;  %s253_s7 = smov 8  }
  0x22   :  { %32 = dma.hbm_to_vmem [thread:$0]  %s325_s1, 256, %s278_s15, [#allocation6], %s252_s0, %s252_s0, %s253_s7  }
  0x23   :  { %244 = dma.done.wait [#allocation3], 32  }
  0x24   :  { %245 = vsyncadd [#allocation3], 4294967264 }
  0x25   :  { %246 = dma.done.wait [#allocation6], 256  }
  0x26   :  { %247 = vsyncadd [#allocation6], 4294967040  ;;  %v254_v0 = vmov 0.0|0.0   ;;  %vm255_vm0 = vmmov 0   ;;  %v256_v1 = vmov 0.0   ;;  %v49_v2 = vld [vmem:[#allocation5] sm:$0xff] }
  0x27   :  { %163 = vmatprep.subr.bf16.mxu0 %v254_v0  ;;  %160 = vmatprep.mubr.msk.f32.mxu0 %vm255_vm0, %v256_v1  ;;  %v50_v3 = vld [vmem:[#allocation5 + $0x8] sm:$0xff]  ;;  %v41_v4 = vld [vmem:[#allocation2] sm:$0x3]  ;;  %vm58_vm1 = vcmask 130048   ;;  %s257_s11 = smov [#allocation7]   ;;  %vm132_vm2 = vcmask 779264  }
  0x28   :  { %v164_v5 = vpack.c.bf16 %v50_v3, %v49_v2  ;;  %v150_v6 = vmul.f32 -1.442695, %v41_v4  ;;  %v151_v11 = vld [vmem:[%s326_s2] ss:$0 sm:$0xff]  ;;  %s140_s12 = sshll.u32 %s257_s11, 4  ;;  %s141_s12 = int_to_ptr.vmem [resolvable:$true] %s140_s12 }
  0x29   :  { %s222_s13 = scalar_lea.vmem %s141_s12, 32  ;;  %p227_p3 = scmp.lt.s32.totalorder %s141_s12, %s141_s12 }
  0x2a   :  { %165 = vmatpush3.bf16.msra.mxu0 %v164_v5  ;;  %174 = vpow2.f32 %v150_v6  ;;  %p223_p2 = scmp.ne.s32.totalorder %s141_s12, %s222_s13  ;;  %p228_p4 = scmp.lt.s32.totalorder %s222_s13, %s222_s13 }
  0x2c   :  { %p229_p5 = por %p228_p4, %p227_p3 }
  0x2e   :  { %p230_p6 = pnand %p229_p5, %p223_p2 }
  0x34   :  { %v175_v7 = vpop.eup %174 }
  0x35   :  { %v45_v8 = vadd.f32 1.0, %v175_v7 }
  0x37   :  { %176 = vrcp.f32 %v45_v8 }
  0x41   :  { %v177_v9 = vpop.eup %176 }
  0x42   :  { %v48_v10 = vmul.f32 %v177_v9, %v41_v4 }
  0x44   :  { %161 = vmatmul.mubr.msk.f32.vlgmr.msra.gmra.mrb[0].mxu0 %vm58_vm1, %v48_v10 }
 0x117   :  { %v128_v12 = vpop.f32.mrb[0].mxu0 }
 0x118   :  { %v129_v13 = vadd.f32 %v151_v11, %v128_v12  ;;  %v162_v14 = vpop.f32.mrb[1].mxu0 }
 0x11a   :  { %133 = vst.msk [vmem:[#allocation7] sm:$0x3] %vm132_vm2, %v129_v13 }
 0x11b   :  { %233 = shalt.err (!%p230_p6)
}
 0x11c   :  { %s234_s16 = scalar_lea.hbm %s327_s3, 32 }
 0x11d   :  { %p235_p7 = scmp.ne.s32.totalorder %s327_s3, %s234_s16  ;;  %p238_p8 = scmp.lt.u32.totalorder %s234_s16, %s327_s3 }
 0x11f   :  { %p240_p9 = pnand %p238_p8, %p235_p7 }
 0x121   :  { %243 = shalt.err (!%p240_p9)
}
 0x122   :  { %143 = dma.vmem_to_hbm [thread:$0]  %s141_s12, 32, %s327_s3, [#allocation4]  }
 0x123   :  { %248 = dma.done.wait [#allocation4], 32  }
 0x124   :  { %249 = vsyncadd [#allocation4], 4294967264 }
 0x125   :  { %147 = vsyncpa [#allocation3], 1 }
 0x126   :  { %148 = vsyncpa [#allocation6], 1 }
 0x127   :  { %149 = vsyncpa [#allocation4], 1 }

</bundles_post_ra>
